<compile_context>
chip_gen: v7x
topology: tpu7x:2x2x1
jax: 0.10.0
libtpu: 0.0.40
codegen_flags: <defaults>
</compile_context>

<pallas_src>
import math

import jax
import jax.numpy as jnp
from jax.experimental import pallas as pl
from jax.experimental.pallas import tpu as pltpu


def _combined_kernel(ids_ref, ratings_ref, emb_ref, rtab_ref,
                     pos_item_ref, pos_rating_ref, out_ref):
    bt, n, d = emb_ref.shape
    r = rtab_ref.shape[0]
    scale = float(d) ** 0.5

    # (bt, 1, n) lane-major int32 -> (bt, n, 1) sublane-major: one relayout each.
    ids = ids_ref[...].reshape(bt, n, 1)
    rat = ratings_ref[...].reshape(bt, n, 1)

    # Rating-embedding "gather" as an R-term select chain on the VPU (exact f32,
    # no padded one-hot intermediate, no MXU pass). rtab is pre-scaled by sqrt(D).
    rat_emb = jnp.zeros((bt, n, d), jnp.float32)
    for k in range(r):                                         # R is tiny & static
        rat_emb = rat_emb + (rat == k).astype(jnp.float32) * rtab_ref[k:k + 1, :]

    mask = ids != 0                                            # (bt, n, 1) bool

    # Cast streamed embeddings to f32 on the VPU (inputs stay native dtype in HBM).
    item_part = emb_ref[...].astype(jnp.float32) * scale + pos_item_ref[...]
    rate_part = rat_emb + pos_rating_ref[...]

    # Single lane-dense full-ref store; mask applied once to the joint value.
    val = jnp.concatenate([item_part, rate_part], axis=-1)     # (bt, n, 2d)
    out_ref[...] = jnp.where(mask, val, 0.0).astype(out_ref.dtype)


def _vmem_limit_bytes():
    """Generation-dependent VMEM limit with headroom for internal scratch."""
    try:
        cap = int(pltpu.get_tpu_info().vmem_capacity_bytes)
    except Exception:
        cap = 64 << 20                 # conservative: v7x per-TensorCore VMEM
    return int(min(cap * 3 // 4, 100 << 20))   # 96 MiB on v5e/v6e, 48 MiB on v7x


def _choose_block_b(B, N, D, R, emb_bytes, out_bytes, vmem_limit):
    lane_n = ((N + 127) // 128) * 128
    # Grid-invariant tables (rating table + 2 positional tables), double-buffered.
    fixed = 2 * (R * D + 2 * N * D) * 4
    per_row = (
        2 * N * D * emb_bytes          # item-emb input tile, double-buffered
        + 2 * N * 2 * D * out_bytes    # output tile, double-buffered
        + 2 * 2 * 8 * lane_n * 4       # ids + ratings (8-sublane padded), 2 bufs
        + 6 * N * D * 4                # in-kernel f32 temporaries (rat_emb/parts/concat)
    )
    budget = int(vmem_limit * 0.8) - fixed
    bb = max(1, budget // per_row)
    bb = min(bb, B)
    if B > 1:
        # Keep at least two grid steps so v7x can shard the "parallel" batch
        # axis across its two TensorCores (near-free on v5e/v6e).
        bb = min(bb, pl.cdiv(B, 2))
    return int(max(1, bb))


def prepare_combined_preproc_params(pos_emb_weight, rating_emb_weight,
                                    seq_len, embedding_dim):
    """One-time parameter prep, hoisted out of the per-step hot path."""
    scale = float(embedding_dim) ** 0.5
    pos = pos_emb_weight[: 2 * seq_len].astype(jnp.float32)
    pos_item = pos[0::2]               # even positions -> item slots
    pos_rating = pos[1::2]             # odd positions  -> rating slots
    rtab_scaled = rating_emb_weight.astype(jnp.float32) * scale   # fold sqrt(D) once
    return pos_item, pos_rating, rtab_scaled


def combined_item_and_rating_preprocessor(past_lengths, past_ids, past_embeddings,
                                          ratings, pos_item, pos_rating, rtab_scaled,
                                          *, block_b=None):
    B, N = past_ids.shape
    D = past_embeddings.shape[-1]
    R = rtab_scaled.shape[0]
    out_dtype = past_embeddings.dtype          # native-dtype output (no f32 blow-up)

    vmem_limit = _vmem_limit_bytes()
    if block_b is None:
        block_b = _choose_block_b(
            B, N, D, R,
            emb_bytes=jnp.dtype(past_embeddings.dtype).itemsize,
            out_bytes=jnp.dtype(out_dtype).itemsize,
            vmem_limit=vmem_limit)
    grid_b = pl.cdiv(B, block_b)

    # (B, 1, N): sequence axis on lanes -> dense DMA, no 128x lane padding.
    ids3 = past_ids.astype(jnp.int32).reshape(B, 1, N)
    ratings3 = ratings.astype(jnp.int32).reshape(B, 1, N)

    out = pl.pallas_call(
        _combined_kernel,
        out_shape=jax.ShapeDtypeStruct((B, N, 2 * D), out_dtype),
        grid=(grid_b,),
        in_specs=[
            pl.BlockSpec((block_b, 1, N), lambda b: (b, 0, 0)),   # ids    (int32)
            pl.BlockSpec((block_b, 1, N), lambda b: (b, 0, 0)),   # ratings (int32)
            pl.BlockSpec((block_b, N, D), lambda b: (b, 0, 0)),   # item embeddings (native dtype)
            pl.BlockSpec((R, D), lambda b: (0, 0)),               # rating table (pre-scaled, f32)
            pl.BlockSpec((N, D), lambda b: (0, 0)),               # pos emb, even rows (item)
            pl.BlockSpec((N, D), lambda b: (0, 0)),               # pos emb, odd rows (rating)
        ],
        out_specs=pl.BlockSpec((block_b, N, 2 * D), lambda b: (b, 0, 0)),
        compiler_params=pltpu.CompilerParams(
            dimension_semantics=("parallel",),
            vmem_limit_bytes=vmem_limit,
        ),
    )(ids3, ratings3, past_embeddings, rtab_scaled, pos_item, pos_rating)

    # (B, N, 2D) -> (B, 2N, D): row 2i = item i, row 2i+1 = rating i
    # (bit-identical to torch.cat(dim=2).view(B, 2N, D)).
    user_embeddings = out.reshape(B, 2 * N, D)

    # Valid mask is a trivial fused XLA op; kept out of the kernel.
    valid_mask = jnp.broadcast_to((past_ids != 0)[:, :, None],
                                  (B, N, 2)).reshape(B, 2 * N, 1).astype(jnp.float32)

    new_lengths = past_lengths * 2
    return new_lengths, user_embeddings, valid_mask


def _reference(past_lengths, past_ids, past_embeddings, ratings,
               pos_emb_weight, rating_emb_weight):
    B, N = past_ids.shape
    D = past_embeddings.shape[-1]
    scale = D ** 0.5
    r_emb = rating_emb_weight[ratings]                              # (B, N, D)
    ue = jnp.concatenate([past_embeddings, r_emb], axis=2) * scale  # (B, N, 2D)
    ue = ue.reshape(B, 2 * N, D)
    ue = ue + pos_emb_weight[jnp.arange(2 * N)][None]
    mask = (past_ids != 0)[:, :, None]
    mask = jnp.broadcast_to(mask, (B, N, 2)).reshape(B, 2 * N, 1).astype(jnp.float32)
    ue = ue * mask
    return past_lengths * 2, ue, mask


if __name__ == "__main__":
    # Small but lane-aligned demo (production D is a multiple of 128, which keeps
    # the concatenated output store fully lane-dense and unmasked).
    B, N, D = 2, 8, 128
    max_sequence_len = N
    num_ratings = 5

    key = jax.random.PRNGKey(0)
    k1, k2, k3, k4, k5 = jax.random.split(key, 5)

    std = math.sqrt(1.0 / D)
    pos_emb_weight = (jax.random.truncated_normal(
        k1, -2.0, 2.0, (max_sequence_len * 2, D), jnp.float32) * std)
    rating_emb_weight = (jax.random.truncated_normal(
        k2, -2.0, 2.0, (num_ratings, D), jnp.float32) * std)

    past_embeddings = jax.random.normal(k3, (B, N, D), jnp.float32)
    past_lengths = jnp.array([5, 8], jnp.int32)
    past_ids = jax.random.randint(k4, (B, N), 1, 1000, jnp.int32)
    past_ids = past_ids * (jnp.arange(N)[None, :] < past_lengths[:, None]).astype(jnp.int32)
    ratings = jax.random.randint(k5, (B, N), 0, num_ratings, jnp.int32)

    # One-time prep (hoisted out of the per-step hot path).
    pos_item, pos_rating, rtab_scaled = prepare_combined_preproc_params(
        pos_emb_weight, rating_emb_weight, max_sequence_len, D)

    # --- f32 path (bit-level parity with the gather reference) ---
    lengths_out, emb_out, mask_out = combined_item_and_rating_preprocessor(
        past_lengths, past_ids, past_embeddings, ratings,
        pos_item, pos_rating, rtab_scaled)
    jax.block_until_ready((lengths_out, emb_out, mask_out))

    ref_lengths, ref_emb, ref_mask = _reference(
        past_lengths, past_ids, past_embeddings, ratings,
        pos_emb_weight, rating_emb_weight)

    assert lengths_out.shape == (B,) and jnp.all(lengths_out == ref_lengths)
    assert emb_out.shape == (B, 2 * N, D) and emb_out.dtype == past_embeddings.dtype
    assert mask_out.shape == (B, 2 * N, 1)
    assert jnp.allclose(emb_out, ref_emb, atol=1e-5, rtol=1e-5)
    assert jnp.allclose(mask_out, ref_mask)

    # --- bf16 native-dtype I/O path (no wrapper up-cast; output stays bf16) ---
    emb_bf16 = past_embeddings.astype(jnp.bfloat16)
    _, emb_out_bf16, _ = combined_item_and_rating_preprocessor(
        past_lengths, past_ids, emb_bf16, ratings,
        pos_item, pos_rating, rtab_scaled)
    jax.block_until_ready(emb_out_bf16)
    assert emb_out_bf16.dtype == jnp.bfloat16
    _, ref_emb_bf16, _ = _reference(
        past_lengths, past_ids, emb_bf16.astype(jnp.float32), ratings,
        pos_emb_weight, rating_emb_weight)
    assert jnp.allclose(emb_out_bf16.astype(jnp.float32), ref_emb_bf16,
                        atol=0.5, rtol=0.05)

    print("KERNEL_OK")
</pallas_src>

<mosaic_0001>
module attributes {stable_mosaic.version = 11 : i64} {
  func.func @_combined_kernel(%arg0: i32, %arg1: memref<1x1x8xi32, #tpu.memory_space<vmem>>, %arg2: memref<1x1x8xi32, #tpu.memory_space<vmem>>, %arg3: memref<1x8x128xf32, #tpu.memory_space<vmem>>, %arg4: memref<5x128xf32, #tpu.memory_space<vmem>>, %arg5: memref<8x128xf32, #tpu.memory_space<vmem>>, %arg6: memref<8x128xf32, #tpu.memory_space<vmem>>, %arg7: memref<1x8x256xf32, #tpu.memory_space<vmem>>) attributes {dimension_semantics = [#tpu.dimension_semantics<parallel>], iteration_bounds = array<i64: 2>, scalar_prefetch = 0 : i64, scratch_operands = 0 : i64, tpu.core_type = #tpu.core_type<tc>, window_params = [{transform_indices = @transform_0, window_bounds = array<i64: 1, 1, 8>}, {transform_indices = @transform_1, window_bounds = array<i64: 1, 1, 8>}, {transform_indices = @transform_2, window_bounds = array<i64: 1, 8, 128>}, {pipeline_mode = #tpu.pipeline_mode<synchronous>, transform_indices = @transform_3, window_bounds = array<i64: 5, 128>}, {pipeline_mode = #tpu.pipeline_mode<synchronous>, transform_indices = @transform_4, window_bounds = array<i64: 8, 128>}, {pipeline_mode = #tpu.pipeline_mode<synchronous>, transform_indices = @transform_5, window_bounds = array<i64: 8, 128>}, {transform_indices = @transform_6, window_bounds = array<i64: 1, 8, 256>}]} {
    %c0 = arith.constant 0 : index
    %c0_0 = arith.constant 0 : index
    %c0_1 = arith.constant 0 : index
    %0 = vector.load %arg1[%c0, %c0_0, %c0_1] : memref<1x1x8xi32, #tpu.memory_space<vmem>>, vector<1x1x8xi32>
    %1 = vector.shape_cast %0 : vector<1x1x8xi32> to vector<1x8x1xi32>
    %c0_2 = arith.constant 0 : index
    %c0_3 = arith.constant 0 : index
    %c0_4 = arith.constant 0 : index
    %2 = vector.load %arg2[%c0_2, %c0_3, %c0_4] : memref<1x1x8xi32, #tpu.memory_space<vmem>>, vector<1x1x8xi32>
    %3 = vector.shape_cast %2 : vector<1x1x8xi32> to vector<1x8x1xi32>
    %cst = arith.constant 0.000000e+00 : f32
    %4 = vector.broadcast %cst : f32 to vector<1x8x128xf32>
    %c0_i32 = arith.constant 0 : i32
    %5 = vector.broadcast %c0_i32 : i32 to vector<1x8x1xi32>
    %6 = arith.cmpi eq, %3, %5 : vector<1x8x1xi32>
    %7 = arith.extui %6 : vector<1x8x1xi1> to vector<1x8x1xi32>
    %8 = arith.sitofp %7 : vector<1x8x1xi32> to vector<1x8x1xf32>
    %c0_5 = arith.constant 0 : index
    %c0_6 = arith.constant 0 : index
    %9 = vector.load %arg4[%c0_5, %c0_6] : memref<5x128xf32, #tpu.memory_space<vmem>>, vector<1x128xf32>
    %10 = vector.shape_cast %9 : vector<1x128xf32> to vector<1x1x128xf32>
    %11 = vector.broadcast %8 : vector<1x8x1xf32> to vector<1x8x128xf32>
    %12 = vector.broadcast %10 : vector<1x1x128xf32> to vector<1x8x128xf32>
    %13 = arith.mulf %11, %12 : vector<1x8x128xf32>
    %14 = arith.addf %4, %13 : vector<1x8x128xf32>
    %c1_i32 = arith.constant 1 : i32
    %15 = vector.broadcast %c1_i32 : i32 to vector<1x8x1xi32>
    %16 = arith.cmpi eq, %3, %15 : vector<1x8x1xi32>
    %17 = arith.extui %16 : vector<1x8x1xi1> to vector<1x8x1xi32>
    %18 = arith.sitofp %17 : vector<1x8x1xi32> to vector<1x8x1xf32>
    %c1 = arith.constant 1 : index
    %c0_7 = arith.constant 0 : index
    %19 = vector.load %arg4[%c1, %c0_7] : memref<5x128xf32, #tpu.memory_space<vmem>>, vector<1x128xf32>
    %20 = vector.shape_cast %19 : vector<1x128xf32> to vector<1x1x128xf32>
    %21 = vector.broadcast %18 : vector<1x8x1xf32> to vector<1x8x128xf32>
    %22 = vector.broadcast %20 : vector<1x1x128xf32> to vector<1x8x128xf32>
    %23 = arith.mulf %21, %22 : vector<1x8x128xf32>
    %24 = arith.addf %14, %23 : vector<1x8x128xf32>
    %c2_i32 = arith.constant 2 : i32
    %25 = vector.broadcast %c2_i32 : i32 to vector<1x8x1xi32>
    %26 = arith.cmpi eq, %3, %25 : vector<1x8x1xi32>
    %27 = arith.extui %26 : vector<1x8x1xi1> to vector<1x8x1xi32>
    %28 = arith.sitofp %27 : vector<1x8x1xi32> to vector<1x8x1xf32>
    %c2 = arith.constant 2 : index
    %c0_8 = arith.constant 0 : index
    %29 = vector.load %arg4[%c2, %c0_8] : memref<5x128xf32, #tpu.memory_space<vmem>>, vector<1x128xf32>
    %30 = vector.shape_cast %29 : vector<1x128xf32> to vector<1x1x128xf32>
    %31 = vector.broadcast %28 : vector<1x8x1xf32> to vector<1x8x128xf32>
    %32 = vector.broadcast %30 : vector<1x1x128xf32> to vector<1x8x128xf32>
    %33 = arith.mulf %31, %32 : vector<1x8x128xf32>
    %34 = arith.addf %24, %33 : vector<1x8x128xf32>
    %c3_i32 = arith.constant 3 : i32
    %35 = vector.broadcast %c3_i32 : i32 to vector<1x8x1xi32>
    %36 = arith.cmpi eq, %3, %35 : vector<1x8x1xi32>
    %37 = arith.extui %36 : vector<1x8x1xi1> to vector<1x8x1xi32>
    %38 = arith.sitofp %37 : vector<1x8x1xi32> to vector<1x8x1xf32>
    %c3 = arith.constant 3 : index
    %c0_9 = arith.constant 0 : index
    %39 = vector.load %arg4[%c3, %c0_9] : memref<5x128xf32, #tpu.memory_space<vmem>>, vector<1x128xf32>
    %40 = vector.shape_cast %39 : vector<1x128xf32> to vector<1x1x128xf32>
    %41 = vector.broadcast %38 : vector<1x8x1xf32> to vector<1x8x128xf32>
    %42 = vector.broadcast %40 : vector<1x1x128xf32> to vector<1x8x128xf32>
    %43 = arith.mulf %41, %42 : vector<1x8x128xf32>
    %44 = arith.addf %34, %43 : vector<1x8x128xf32>
    %c4_i32 = arith.constant 4 : i32
    %45 = vector.broadcast %c4_i32 : i32 to vector<1x8x1xi32>
    %46 = arith.cmpi eq, %3, %45 : vector<1x8x1xi32>
    %47 = arith.extui %46 : vector<1x8x1xi1> to vector<1x8x1xi32>
    %48 = arith.sitofp %47 : vector<1x8x1xi32> to vector<1x8x1xf32>
    %c4 = arith.constant 4 : index
    %c0_10 = arith.constant 0 : index
    %49 = vector.load %arg4[%c4, %c0_10] : memref<5x128xf32, #tpu.memory_space<vmem>>, vector<1x128xf32>
    %50 = vector.shape_cast %49 : vector<1x128xf32> to vector<1x1x128xf32>
    %51 = vector.broadcast %48 : vector<1x8x1xf32> to vector<1x8x128xf32>
    %52 = vector.broadcast %50 : vector<1x1x128xf32> to vector<1x8x128xf32>
    %53 = arith.mulf %51, %52 : vector<1x8x128xf32>
    %54 = arith.addf %44, %53 : vector<1x8x128xf32>
    %c0_i32_11 = arith.constant 0 : i32
    %55 = vector.broadcast %c0_i32_11 : i32 to vector<1x8x1xi32>
    %56 = arith.cmpi ne, %1, %55 : vector<1x8x1xi32>
    %c0_12 = arith.constant 0 : index
    %c0_13 = arith.constant 0 : index
    %c0_14 = arith.constant 0 : index
    %57 = vector.load %arg3[%c0_12, %c0_13, %c0_14] : memref<1x8x128xf32, #tpu.memory_space<vmem>>, vector<1x8x128xf32>
    %cst_15 = arith.constant 11.3137083 : f32
    %58 = vector.broadcast %cst_15 : f32 to vector<1x8x128xf32>
    %59 = arith.mulf %57, %58 : vector<1x8x128xf32>
    %c0_16 = arith.constant 0 : index
    %c0_17 = arith.constant 0 : index
    %60 = vector.load %arg5[%c0_16, %c0_17] : memref<8x128xf32, #tpu.memory_space<vmem>>, vector<8x128xf32>
    %61 = vector.shape_cast %60 : vector<8x128xf32> to vector<1x8x128xf32>
    %62 = arith.addf %59, %61 : vector<1x8x128xf32>
    %c0_18 = arith.constant 0 : index
    %c0_19 = arith.constant 0 : index
    %63 = vector.load %arg6[%c0_18, %c0_19] : memref<8x128xf32, #tpu.memory_space<vmem>>, vector<8x128xf32>
    %64 = vector.shape_cast %63 : vector<8x128xf32> to vector<1x8x128xf32>
    %65 = arith.addf %54, %64 : vector<1x8x128xf32>
    %66 = tpu.concatenate %62, %65 in 2 : vector<1x8x128xf32>, vector<1x8x128xf32> -> vector<1x8x256xf32>
    %cst_20 = arith.constant 0.000000e+00 : f32
    %67 = vector.shape_cast %56 : vector<1x8x1xi1> to vector<1x8x1xi1>
    %68 = vector.broadcast %67 : vector<1x8x1xi1> to vector<1x8x256xi1>
    %69 = vector.broadcast %cst_20 : f32 to vector<1x8x256xf32>
    %70 = arith.select %68, %66, %69 : vector<1x8x256xi1>, vector<1x8x256xf32>
    %c0_21 = arith.constant 0 : index
    %c0_22 = arith.constant 0 : index
    %c0_23 = arith.constant 0 : index
    %71 = vector.load %arg7[%c0_21, %c0_22, %c0_23] : memref<1x8x256xf32, #tpu.memory_space<vmem>>, vector<1x8x256xf32>
    tpu.vector_store %arg7[%c0_21, %c0_22, %c0_23], %70 {strides = array<i32>} : memref<1x8x256xf32, #tpu.memory_space<vmem>>, vector<1x8x256xf32>,
    return
  }
  func.func @transform_0(%arg0: i32) -> (i32, i32, i32) {
    %c0_i32 = arith.constant 0 : i32
    %c0_i32_0 = arith.constant 0 : i32
    %c0_i32_1 = arith.constant 0 : i32
    return %arg0, %c0_i32, %c0_i32_0 : i32, i32, i32
  }
  func.func @transform_1(%arg0: i32) -> (i32, i32, i32) {
    %c0_i32 = arith.constant 0 : i32
    %c0_i32_0 = arith.constant 0 : i32
    %c0_i32_1 = arith.constant 0 : i32
    return %arg0, %c0_i32, %c0_i32_0 : i32, i32, i32
  }
  func.func @transform_2(%arg0: i32) -> (i32, i32, i32) {
    %c0_i32 = arith.constant 0 : i32
    %c0_i32_0 = arith.constant 0 : i32
    %c0_i32_1 = arith.constant 0 : i32
    return %arg0, %c0_i32, %c0_i32_0 : i32, i32, i32
  }
  func.func @transform_3(%arg0: i32) -> (i32, i32) {
    %c0_i32 = arith.constant 0 : i32
    %c0_i32_0 = arith.constant 0 : i32
    %c0_i32_1 = arith.constant 0 : i32
    return %c0_i32, %c0_i32_0 : i32, i32
  }
  func.func @transform_4(%arg0: i32) -> (i32, i32) {
    %c0_i32 = arith.constant 0 : i32
    %c0_i32_0 = arith.constant 0 : i32
    %c0_i32_1 = arith.constant 0 : i32
    return %c0_i32, %c0_i32_0 : i32, i32
  }
  func.func @transform_5(%arg0: i32) -> (i32, i32) {
    %c0_i32 = arith.constant 0 : i32
    %c0_i32_0 = arith.constant 0 : i32
    %c0_i32_1 = arith.constant 0 : i32
    return %c0_i32, %c0_i32_0 : i32, i32
  }
  func.func @transform_6(%arg0: i32) -> (i32, i32, i32) {
    %c0_i32 = arith.constant 0 : i32
    %c0_i32_0 = arith.constant 0 : i32
    %c0_i32_1 = arith.constant 0 : i32
    return %arg0, %c0_i32, %c0_i32_0 : i32, i32, i32
  }
}

</mosaic_0001>

<bundles_post_ra>
// kernel: tpu_custom_call.1
= control target key start
LH: loop header
LB: loop body
LE: loop exit
PB: predicated region body
PF: predicated region fallthrough
CT: control target
= control target key end

     0   :  { %s1093_s0 = inlined_call_operand.hbm [shape: s32[2,1,8], index: 0, kind: input, shape index: {}]   ;;  %s1094_s1 = inlined_call_operand.vmem [shape: s32[2,1,8], index: 1, kind: input, shape index: {}]   ;;  %s1095_s2 = inlined_call_operand.hbm [shape: f32[2,8,128], index: 2, kind: input, shape index: {}]   ;;  %s1096_s3 = inlined_call_operand.vmem [shape: f32[5,128], index: 3, kind: input, shape index: {}]   ;;  %s1097_s4 = inlined_call_operand.hbm [shape: f32[8,128], index: 4, kind: input, shape index: {}]   ;;  %s1098_s5 = inlined_call_operand.vmem [shape: f32[8,128], index: 5, kind: input, shape index: {}]   ;;  %s1099_s6 = inlined_call_operand.hbm [shape: f32[2,8,256], index: 6, kind: output, shape index: {}]  }
   0x1   :  { %1104 = sst [smem:[#allocation13_spill]] %s1093_s0 }
   0x2   :  { %1105 = sst [smem:[#allocation14_spill]] %s1097_s4 }
   0x3   :  { %11 = vsyncpa [#allocation3], 0 }
   0x4   :  { %13 = vsyncpa [#allocation3 + $0x1], 0 }
   0x5   :  { %14 = vsyncpa [#allocation6], 0 }
   0x6   :  { %16 = vsyncpa [#allocation6 + $0x1], 0 }
   0x7   :  { %17 = vsyncpa [#allocation4], 0 }
   0x8   :  { %19 = vsyncpa [#allocation4 + $0x1], 0  ;;  %s825_s21 = smov 0   ;;  %s827_s22 = smov 0  }
   0x9   :  { %s829_s23 = smov 0   ;;  %s831_s24 = smov 0  }
   0xa LB: > { %s846_s25 = sadd.s32 4294967295, %s783_s24   ;;  %s529_s26 = sadd.s32 4294967294, %s783_s24   ;;  %s783_s24 = sphi %s831_s24, %s1128_s24   ;;  %s779_s23 = sphi %s829_s23, %s1127_s23   ;;  %s775_s22 = sphi %s827_s22, %s1126_s22   ;;  %s771_s21 = sphi %s825_s21, %s1125_s21  }
   0xb   : > { %s850_s27 = sadd.s32 1, %s783_s24   ;;  %s32_s28 = sadd.s32 1, %s779_s23 }
   0xc   : > { %s29_s29 = ssub.s32 %s783_s24, %s850_s27  ;;  %p39_p0 = scmp.ne.s32.totalorder %s779_s23, %s775_s22 }
   0xd   : > { %p30_p1 = scmp.eq.s32.totalorder %s29_s29, 0  ;;  %p45_p2 = scmp.ne.s32.totalorder %s775_s22, %s771_s21 }
   0xe   : > { %p1100_p3 = scmp.eq.s32.totalorder %s846_s25, 0  ;;  %p184_p4 = scmp.eq.s32.totalorder %s846_s25, 1 }
   0xf   : > { %s862_s30 = scalar_select %p30_p1, %s779_s23, %s32_s28  }
  0x10   : > { %p866_p5 = por %p1100_p3, %p45_p2  ;;  %p873_p6 = por %p184_p4, %p39_p0 }
  0x11   : > { %p190_p7 = scmp.eq.s32.totalorder %s529_s26, 1  ;;  %p530_p8 = scmp.ge.s32.totalorder %s783_s24, 1 }
  0x12   : > { %s1106_s7 = scalar_select %p866_p5, 1, 0 }
  0x13   : > { %s1107_s8 = scalar_select %p873_p6, 1, 0 }
  0x14   : > { %p197_p9 = scmp.lt.s32.totalorder %s783_s24, 3  ;;  %p879_p10 = por %p190_p7, %p45_p2 }
  0x15   : > { %s785_s11 = smov [#allocation7]   ;;  %p40_p1 = scmp.eq.s32.totalorder %s783_s24, 0 }
  0x16   : > { %s1108_s9 = scalar_select %p879_p10, 1, 0 }
  0x17   : > { %p883_p11 = pnand %p530_p8, %p197_p9  ;;  %s213_s12 = sshll.u32 %s785_s11, 4  ;;  %s214_s12 = int_to_ptr.vmem [resolvable:$true] %s213_s12 }
  0x18   : > { %s893_s13 = sand.u32 1, %s779_s23   ;;  %p904_p7 = por %p40_p1, %p39_p0 }
  0x19   : > { %s1109_s10 = scalar_select %p883_p11, 1, 0 }
  0x1a   : > { %p568_p13 = pneg %p883_p11  ;;  %s533_s16 = sshll.u32 %s783_s24, 4 }
  0x1b   : > { %s1111_s15 = scalar_select %p904_p7, 1, 0 }
  0x1c   : > { %p897_p2 = pnand %p568_p13, %p1100_p3  ;;  %s1112_s4 = sld [smem:[#allocation14_spill]] }
  0x1e   : > { %p623_p9 = pneg %p897_p2 }
  0x22   : > { %s621_s19 = scalar_lea.hbm %s1112_s4, 128 }
  0x23   : > { %p622_p8 = scmp.ne.s32.totalorder %s1112_s4, %s621_s19  ;;  %p628_p0 = scmp.lt.u32.totalorder %s621_s19, %s1112_s4 }
  0x25   : > { %p624_p13 = pnand %p623_p9, %p622_p8 }
  0x27   : > { %p625_p12 = pneg %p624_p13 }
  0x29   : > { %p630_p1 = pnand %p628_p0, %p625_p12 }
  0x2b   : > { %633 = shalt.err (!%p630_p1)
}
  0x2c   : > { %s634_s11 = scalar_lea.vmem %s214_s12, 128  ;;  %p642_p6 = scmp.lt.s32.totalorder %s214_s12, %s214_s12 }
  0x2d   : > { %p635_p3 = scmp.ne.s32.totalorder %s214_s12, %s634_s11  ;;  %p643_p5 = scmp.lt.s32.totalorder %s634_s11, %s634_s11 }
  0x2f   : > { %p637_p4 = pnand %p635_p3, %p623_p9  ;;  %p644_p11 = por %p643_p5, %p642_p6 }
  0x31   : > { %p638_p10 = pneg %p637_p4 }
  0x33   : > { %p645_p7 = pnand %p644_p11, %p638_p10 }
  0x35   : > { %648 = shalt.err (!%p645_p7)
}
  0x36   : > { %571 = dma.hbm_to_vmem [thread:$0]  (!%p897_p2), %s1112_s4, 128, %s214_s12, [#allocation6]  }
  0x37   : > { %s1113_s0 = sld [smem:[#allocation13_spill]]  ;;  %s230_s28 = scalar_lea.vmem [#allocation2], %s893_s13 }
  0x38   : > { %s237_s14 = sshll.u32 %s230_s28, 4  ;;  %p1114_p3 = scmp.ne.s32.totalorder %s1111_s15, 0  ;;  %s931_s14 = int_to_ptr.vmem [resolvable:$true] %s237_s14 }
  0x39   : > { %p1115_p5 = scmp.lt.s32.totalorder %s783_s24, 2  ;;  %s534_s11 = sshll.u32 %s893_s13, 3 }
  0x3b   : > { %p937_p6 = pnand %p1115_p5, %p1114_p3 }
  0x3d   : > { %s928_s26 = scalar_lea.hbm %s1113_s0, %s533_s16  ;;  %s228_s16 = scalar_lea.sflag [#allocation3], %s893_s13 }
  0x3e   : > { %s649_s17 = scalar_lea.hbm %s928_s26, 16  ;;  %p651_p11 = pneg %p937_p6 }
  0x3f   : > { %p650_p10 = scmp.ne.s32.totalorder %s928_s26, %s649_s17  ;;  %s654_s19 = scalar_lea.hbm %s1113_s0, 32 }
  0x40   : > { %p655_p2 = scmp.lt.u32.totalorder %s928_s26, %s1113_s0  ;;  %p656_p7 = scmp.lt.u32.totalorder %s654_s19, %s649_s17 }
  0x41   : > { %p652_p12 = pnand %p651_p11, %p650_p10  ;;  %p658_p9 = scmp.lt.u32.totalorder %s649_s17, %s928_s26 }
  0x42   : > { %p657_p8 = por %p656_p7, %p655_p2 }
  0x43   : > { %p653_p4 = pneg %p652_p12 }
  0x44   : > { %p659_p13 = por %p658_p9, %p657_p8 }
  0x46   : > { %p660_p0 = pnand %p659_p13, %p653_p4 }
  0x48   : > { %663 = shalt.err (!%p660_p0)
}
  0x49   : > { %s664_s12 = scalar_lea.vmem %s931_s14, 16  ;;  %s786_s18 = smov [#allocation2]  }
  0x4a   : > { %p665_p1 = scmp.ne.s32.totalorder %s931_s14, %s664_s12  ;;  %s669_s15 = sshll.u32 %s786_s18, 4  ;;  %s670_s15 = int_to_ptr.vmem [resolvable:$false] %s669_s15 }
  0x4b   : > { %s671_s20 = scalar_lea.vmem %s670_s15, 32  ;;  %p672_p10 = scmp.lt.s32.totalorder %s931_s14, %s670_s15 }
  0x4c   : > { %p667_p3 = pnand %p665_p1, %p651_p11  ;;  %p673_p12 = scmp.lt.s32.totalorder %s671_s20, %s664_s12 }
  0x4e   : > { %p668_p5 = pneg %p667_p3  ;;  %p674_p2 = por %p673_p12, %p672_p10 }
  0x50   : > { %p675_p7 = pnand %p674_p2, %p668_p5 }
  0x52   : > { %678 = shalt.err (!%p675_p7)
}
  0x53   : > { %575 = dma.hbm_to_vmem [thread:$0]  (!%p937_p6), %s928_s26, 16, %s931_s14, %s228_s16  }
  0x54   : > { %s535_s17 = sshll.u32 %s783_s24, 7  ;;  %s254_s12 = scalar_lea.vmem [#allocation5], %s534_s11 }
  0x55   : > { %s973_s18 = scalar_lea.hbm %s1095_s2, %s535_s17  ;;  %s261_s15 = sshll.u32 %s254_s12, 4  ;;  %s262_s15 = int_to_ptr.vmem [resolvable:$true] %s261_s15 }
  0x56   : > { %s1117_s20 = sand.u32 1, %s783_s24   ;;  %s679_s4 = scalar_lea.hbm %s973_s18, 128 }
  0x57   : > { %s251_s0 = scalar_lea.sflag [#allocation6], %s1117_s20  ;;  %p680_p4 = scmp.ne.s32.totalorder %s973_s18, %s679_s4 }
  0x58   : > { %s684_s16 = scalar_lea.hbm %s1095_s2, 256  ;;  %p685_p13 = scmp.lt.u32.totalorder %s973_s18, %s1095_s2 }
  0x59   : > { %p682_p8 = pnand %p680_p4, %p651_p11  ;;  %p686_p0 = scmp.lt.u32.totalorder %s684_s16, %s679_s4 }
  0x5a   : > { %p688_p3 = scmp.lt.u32.totalorder %s679_s4, %s973_s18 }
  0x5b   : > { %p683_p9 = pneg %p682_p8  ;;  %p687_p1 = por %p686_p0, %p685_p13 }
  0x5d   : > { %p689_p5 = por %p688_p3, %p687_p1 }
  0x5f   : > { %p690_p10 = pnand %p689_p5, %p683_p9 }
  0x61   : > { %693 = shalt.err (!%p690_p10)
}
  0x62   : > { %s694_s11 = scalar_lea.vmem %s262_s15, 128  ;;  %s787_s19 = smov [#allocation5]  }
  0x63   : > { %p695_p12 = scmp.ne.s32.totalorder %s262_s15, %s694_s11  ;;  %s699_s28 = sshll.u32 %s787_s19, 4  ;;  %s700_s28 = int_to_ptr.vmem [resolvable:$false] %s699_s28 }
  0x64   : > { %s701_s12 = scalar_lea.vmem %s700_s28, 256  ;;  %p702_p4 = scmp.lt.s32.totalorder %s262_s15, %s700_s28 }
  0x65   : > { %p697_p2 = pnand %p695_p12, %p651_p11  ;;  %p703_p8 = scmp.lt.s32.totalorder %s701_s12, %s694_s11 }
  0x67   : > { %p698_p7 = pneg %p697_p2  ;;  %p704_p0 = por %p703_p8, %p702_p4 }
  0x69   : > { %p705_p13 = pnand %p704_p0, %p698_p7 }
  0x6b   : > { %708 = shalt.err (!%p705_p13)
}
  0x6c   : > { %578 = dma.hbm_to_vmem [thread:$0]  (!%p937_p6), %s973_s18, 128, %s262_s15, %s251_s0  }
  0x6d   : > { %p1118_p9 = scmp.ne.s32.totalorder %s1109_s10, 0 }
  0x6e   : > { %s1001_s4 = sand.u32 (!%p1118_p9), 1, %s775_s22   ;;  %p1119_p11 = scmp.ne.s32.totalorder (!%p1118_p9), %s1106_s7, 0 }
  0x6f   : > { %270 = sbr.rel (%p1118_p9) target bundleno = 275 (0x113), region = 44  ;;  %s273_s20 = scalar_lea.sflag (!%p1118_p9), [#allocation3], %s1001_s4 }
  0x70   : > { %s275_s26 = scalar_lea.vmem (!%p1118_p9), [#allocation2], %s1001_s4 }
  0x76   : > { %754 = dma.done.wait (%p1119_p11), %s273_s20, 16  }
  0x77   : > { %756 = vsyncadd (%p1119_p11), %s273_s20, 4294967280  ;;  %s280_s0 = sand.u32 1, %s846_s25   ;;  %s537_s29 = sshll.u32 %s1001_s4, 3 }
  0x78   : > { %s281_s10 = scalar_lea.sflag [#allocation6], %s280_s0  ;;  %s284_s18 = scalar_lea.vmem [#allocation5], %s537_s29 }
  0x79   : > { %758 = dma.done.wait (%p1119_p11), %s281_s10, 128  }
  0x7a   : > { %760 = vsyncadd (%p1119_p11), %s281_s10, 4294967168  ;;  %p1120_p6 = scmp.eq.s32.totalorder %s846_s25, 0 }
  0x7c   : > { %762 = dma.done.wait (%p1120_p6), [#allocation6], 128   ;;  %p1121_p1 = pmov %p1120_p6 }
  0x7d   : > { %p324_p3 = scmp.lt.s32.totalorder %s846_s25, 1  ;;  %v540_v1 = vld [vmem:[%s275_s26] ss:$0 sm:$0xff]  ;;  %v396_v4 = vld [vmem:[#allocation7] sm:$0xff]  ;;  %v545_v6 = vld [vmem:[%s1096_s3 + $0x1] ss:$0 sm:$0xff] }
  0x7e   : > { %764 = vsyncadd (%p1121_p1), [#allocation6], 4294967168  ;;  %v394_v2 = vld [vmem:[%s284_s18] sm:$0xff]  ;;  %s539_s28 = sshll.u32 %s1001_s4, 4  ;;  %v547_v8 = vld [vmem:[%s1096_s3 + $0x2] ss:$0 sm:$0xff] }
  0x7f   : > { %s325_s15 = scalar_select %p324_p3, %s846_s25, 1  ;;  %v395_v3 = vmul.f32 11.313708, %v394_v2  ;;  %v543_v5 = vld [vmem:[%s1096_s3] ss:$0 sm:$0xff]  ;;  %v788_v9 = vmov 0.0  }
  0x80   : > { %v549_v17 = vld [vmem:[%s1096_s3 + $0x3] ss:$0 sm:$0xff]  ;;  %v551_v22 = vld [vmem:[%s1096_s3 + $0x4] ss:$0 sm:$0xff]  ;;  %s323_s18 = scalar_lea.vmem [#allocation8], %s539_s28  ;;  %s407_s19 = scalar_lea.sflag [#allocation4], %s1001_s4 }
  0x81   : > { %s326_s13 = scalar_lea.vmem %s1094_s1, %s325_s15  ;;  %v397_v13 = vadd.f32 %v396_v4, %v395_v3  ;;  %v398_v28 = vld [vmem:[%s1098_s5] sm:$0xff]  ;;  %s421_s16 = sshll.u32 %s323_s18, 4  ;;  %s1045_s16 = int_to_ptr.vmem [resolvable:$true] %s421_s16 }
  0x82   : > { %v541_v0 = vld [vmem:[%s326_s13] ss:$0 sm:$0xff]  ;;  %s557_s13 = sshll.u32 %s846_s25, 8  ;;  %s709_s28 = scalar_lea.vmem %s1045_s16, 256 }
  0x83   : > { %341 = vbcast.lane.b32.xlu0 %v541_v0, 256  ;;  %s1050_s11 = scalar_lea.hbm %s1099_s6, %s557_s13  ;;  %p710_p5 = scmp.ne.s32.totalorder %s1045_s16, %s709_s28 }
  0x84   : > { %p1122_p10 = scmp.ne.s32.totalorder %s1107_s8, 0  ;;  %s789_s25 = smov [#allocation8]  }
  0x85   : > { %s713_s12 = sshll.u32 %s789_s25, 4  ;;  %s714_s12 = int_to_ptr.vmem [resolvable:$false] %s713_s12 }
  0x86   : > { %p711_p12 = pnand %p710_p5, %p1122_p10  ;;  %s715_s20 = scalar_lea.vmem %s714_s12, 512 }
  0x87   : > { %333 = vbcast.lane.b32.xlu0 %v540_v1, 256  ;;  %p716_p7 = scmp.lt.s32.totalorder %s1045_s16, %s714_s12  ;;  %p717_p4 = scmp.lt.s32.totalorder %s715_s20, %s709_s28 }
  0x88   : > { %p712_p2 = pneg %p711_p12 }
  0x89   : > { %p718_p8 = por %p717_p4, %p716_p7 }
  0x8b   : > { %p719_p0 = pnand %p718_p8, %p712_p2 }
  0xf5   : > { %v342_v7 = vpop.permute.xlu0 %341 }
  0xf6   : > { %vm343_vm0 = vcmp.eq.s32.totalorder %v342_v7, 0  ;;  %vm353_vm1 = vcmp.eq.s32.totalorder %v342_v7, 1  ;;  %vm363_vm2 = vcmp.eq.s32.totalorder %v342_v7, 2  ;;  %vm373_vm3 = vcmp.eq.s32.totalorder %v342_v7, 3 }
  0xf7   : > { %v542_v10 = vsel %vm343_vm0, 1.0, %v788_v9  ;;  %v544_v11 = vsel %vm353_vm1, 1.0, %v788_v9  ;;  %v546_v12 = vsel %vm363_vm2, 1.0, %v788_v9  ;;  %vm383_vm4 = vcmp.eq.s32.totalorder %v342_v7, 4 }
  0xf8   : > { %v351_v14 = vmul.f32 %v543_v5, %v542_v10  ;;  %v361_v15 = vmul.f32 %v545_v6, %v544_v11  ;;  %v548_v16 = vsel %vm373_vm3, 1.0, %v788_v9  ;;  %v371_v19 = vmul.f32 %v547_v8, %v546_v12 }
  0xf9   : > { %v334_v18 = vpop.permute.xlu0 %333  ;;  %v550_v21 = vsel %vm383_vm4, 1.0, %v788_v9  ;;  %v381_v25 = vmul.f32 %v549_v17, %v548_v16 }
  0xfa   : > { %v362_v20 = vadd.f32 %v361_v15, %v351_v14  ;;  %vm393_vm5 = vcmp.ne.s32.totalorder %v334_v18, 0  ;;  %v391_v27 = vmul.f32 %v551_v22, %v550_v21 }
  0xfb   : > { %v402_v23 = vsel %vm393_vm5, %v397_v13, 0.0 }
  0xfc   : > { %v372_v24 = vadd.f32 %v371_v19, %v362_v20  ;;  %404 = vst [vmem:[%s323_s18] sm:$0xff] %v402_v23 }
  0xfe   : > { %v382_v26 = vadd.f32 %v381_v25, %v372_v24 }
 0x100   : > { %v392_v29 = vadd.f32 %v391_v27, %v382_v26 }
 0x102   : > { %v399_v30 = vadd.f32 %v398_v28, %v392_v29 }
 0x104   : > { %v403_v31 = vsel %vm393_vm5, %v399_v30, 0.0 }
 0x105   : > { %405 = vst [vmem:[%s323_s18 + $0x8] sm:$0xff] %v403_v31 }
 0x106   : > { %722 = shalt.err (!%p719_p0)
}
 0x107   : > { %s723_s4 = scalar_lea.hbm %s1050_s11, 256  ;;  %s727_s29 = scalar_lea.hbm %s1099_s6, 512 }
 0x108   : > { %p724_p13 = scmp.ne.s32.totalorder %s1050_s11, %s723_s4  ;;  %p728_p6 = scmp.lt.u32.totalorder %s1050_s11, %s1099_s6 }
 0x109   : > { %p729_p1 = scmp.lt.u32.totalorder %s727_s29, %s723_s4  ;;  %p731_p5 = scmp.lt.u32.totalorder %s723_s4, %s1050_s11 }
 0x10a   : > { %p725_p9 = pnand %p724_p13, %p1122_p10 }
 0x10b   : > { %p730_p3 = por %p729_p1, %p728_p6 }
 0x10c   : > { %p726_p11 = pneg %p725_p9 }
 0x10d   : > { %p732_p12 = por %p731_p5, %p730_p3 }
 0x10f   : > { %p733_p2 = pnand %p732_p12, %p726_p11 }
 0x111   : > { %736 = shalt.err (!%p733_p2)
}
 0x112   : > { %566 = dma.vmem_to_hbm [thread:$0]  (%p1122_p10), %s1045_s16, 256, %s1050_s11, %s407_s19  }
 0x113 PF: > { %s433_s15 = sand.u32 1, %s771_s21   ;;  %p1123_p7 = scmp.ne.s32.totalorder %s1108_s9, 0 }
 0x114   : > { %p1124_p4 = scmp.ge.s32.totalorder %s783_s24, 2  ;;  %s434_s14 = scalar_lea.sflag [#allocation4], %s433_s15 }
 0x116   : > { %p580_p8 = pnand %p1124_p4, %p1123_p7 }
 0x118   : > { %766 = dma.done.wait (!%p580_p8), %s434_s14, 256  }
 0x119   : > { %768 = vsyncadd (!%p580_p8), %s434_s14, 4294967040  ;;  %p22_p0 = scmp.ge.s32.totalorder %s850_s27, 4   ;;  %s1125_s21 = smov %s775_s22 }
 0x11a   : > { %s1126_s22 = smov %s779_s23  ;;  %s1127_s23 = smov %s862_s30 }
 0x11b   : > { %s1128_s24 = smov %s850_s27  ;;  %24 = sbr.rel (!%p22_p0) target bundleno = 10 (0xa), region = 109 }
 0x122   :  { %439 = vsyncpa [#allocation3], 1 }
 0x123   :  { %441 = vsyncpa [#allocation3 + $0x1], 1 }
 0x124   :  { %442 = vsyncpa [#allocation6], 1 }
 0x125   :  { %444 = vsyncpa [#allocation6 + $0x1], 1 }
 0x126   :  { %445 = vsyncpa [#allocation4], 1 }
 0x127   :  { %447 = vsyncpa [#allocation4 + $0x1], 1 }

</bundles_post_ra>
